<compile_context>
chip_gen: v6e
topology: v6e:2x2x1
jax: 0.10.0
libtpu: 0.0.40
codegen_flags: <defaults>
</compile_context>

<pallas_src>
import jax
import jax.numpy as jnp
import numpy as np
from jax.experimental import pallas as pl
from jax.experimental.pallas import tpu as pltpu


def _round_up(x, m):
    return ((x + m - 1) // m) * m


# ---------------------------------------------------------------------------
# Wrapper + kernel.  One grid step handles TB slabs x N agents = RB columns,
# feature-major (transposed): operands are (features, columns).
# ---------------------------------------------------------------------------
def qtran_q_alt(state, hidden_states, actions, params, *, slab_block=512):
    E, T, N, A = actions.shape
    S = state.shape[-1]
    H = hidden_states.shape[-1]
    Q = params["wq2"].shape[-1]
    HA = H + A
    B = E * T

    f32, bf16 = jnp.float32, jnp.bfloat16

    # ---- tile sizing: TB slabs per grid step, TB a multiple of 128 ----------
    TB = _round_up(min(slab_block, B), 128)
    grid = (B + TB - 1) // TB
    Bp = grid * TB                  # padded slab count
    RB = N * TB                     # columns per grid step (agent-major)
    S_pad = _round_up(S, 16)        # clean bf16 sublane packing
    BPAD = _round_up(max(HA, Q), 8)  # per-bias sublane stride in the bias pack

    # ---- kernel -------------------------------------------------------------
    def kernel(st_ref, ha_ref, wenc1_ref, wa2_ref, wh2_ref,
               wq1s_ref, wq1h_ref, wq1a_ref, wq2_ref, wq3_ref,
               bias_ref, out_ref):
        def group_sum(x):
            # per-slab sum over agents: static 128-aligned lane slices (VPU)
            s = x[:, 0:TB]
            for a in range(1, N):
                s = s + x[:, a * TB:(a + 1) * TB]
            return s

        # packed biases: 8-aligned sublane slices only, shapes (d, 1) f32
        b1p = bias_ref[0 * BPAD:0 * BPAD + HA, :]    # [bh1 | ba1]
        ba2 = bias_ref[1 * BPAD:1 * BPAD + A, :]
        bh2n = bias_ref[2 * BPAD:2 * BPAD + H, :]    # N * bh2 (hoisted sum)
        bq1 = bias_ref[3 * BPAD:3 * BPAD + Q, :]
        bq2 = bias_ref[4 * BPAD:4 * BPAD + Q, :]
        bq3 = bias_ref[5 * BPAD:5 * BPAD + A, :]

        # ---- fused encoder layer 1: block-diag(Wh1, Wa1) on [hidden|action]
        z1 = jnp.maximum(
            jnp.dot(wenc1_ref[...], ha_ref[...],
                    preferred_element_type=f32) + b1p, 0.0)        # (HA, RB)
        h1 = z1[0:H, :]                                            # (H, RB)
        a1 = z1[H:HA, :]                                           # (A, RB)

        # ---- hidden path: group-sum hoisted above layer 2 & wq1_h ----------
        h1s = group_sum(h1)                                        # (H, TB) f32
        he_sum = jnp.dot(wh2_ref[...], h1s.astype(bf16),
                         preferred_element_type=f32) + bh2n        # (H, TB)

        # ---- action encoder layer 2 over all columns -----------------------
        a_enc = jnp.dot(wa2_ref[...], a1.astype(bf16),
                        preferred_element_type=f32) + ba2          # (A, RB)

        # ---- first q layer: three partial dots, adjacent, f32 accumulation -
        a_enc_b = a_enc.astype(bf16)
        he_b = he_sum.astype(bf16)
        u = jnp.dot(wq1a_ref[...], a_enc_b, preferred_element_type=f32)   # (Q, RB)
        v = jnp.dot(wq1h_ref[...], he_b, preferred_element_type=f32)      # (Q, TB)
        stq = jnp.dot(wq1s_ref[...], st_ref[...],
                      preferred_element_type=f32)                         # (Q, RB)

        usum = group_sum(u)                                        # (Q, TB) f32
        vu = jnp.concatenate([v + usum] * N, axis=-1)              # (Q, RB)
        # sum-minus-self kept in f32 to avoid extra cancellation error
        q = jnp.maximum(stq + vu - u + bq1, 0.0)                   # (Q, RB)
        q = jnp.maximum(
            jnp.dot(wq2_ref[...], q.astype(bf16),
                    preferred_element_type=f32) + bq2, 0.0)        # (Q, RB)
        q = jnp.dot(wq3_ref[...], q.astype(bf16),
                    preferred_element_type=f32) + bq3              # (A, RB)
        out_ref[...] = q.astype(out_ref.dtype)

    # ---- data: (E,T,N,d) -> (d, grid*N*TB), column = g*RB + agent*TB + slab -
    def prep_T(x, d):
        x = x.reshape(B, N, d).astype(f32)
        if Bp != B:
            x = jnp.pad(x, ((0, Bp - B), (0, 0), (0, 0)))
        x = x.reshape(grid, TB, N, d)
        x = jnp.transpose(x, (3, 0, 2, 1))       # (d, grid, N, TB)
        return x.reshape(d, grid * N * TB)

    stT = prep_T(state, S)
    stT = jnp.pad(stT, ((0, S_pad - S), (0, 0))).astype(bf16)        # (S_pad, C)
    haT = jnp.concatenate([prep_T(hidden_states, H), prep_T(actions, A)],
                          axis=0).astype(bf16)                       # (HA, C)

    # ---- weights: pre-transposed to (out, in), bf16 --------------------------
    w_enc1 = jnp.zeros((HA, HA), f32)
    w_enc1 = w_enc1.at[:H, :H].set(params["wh1"].T.astype(f32))
    w_enc1 = w_enc1.at[H:, H:].set(params["wa1"].T.astype(f32))
    w_enc1 = w_enc1.astype(bf16)                                     # (HA, HA)
    wa2T = params["wa2"].T.astype(bf16)                              # (A, A)
    wh2T = params["wh2"].T.astype(bf16)                              # (H, H)
    wq1 = params["wq1"].astype(f32)                                  # (S+H+A, Q)
    wq1sT = jnp.pad(wq1[:S].T, ((0, 0), (0, S_pad - S))).astype(bf16)  # (Q, S_pad)
    wq1hT = wq1[S:S + H].T.astype(bf16)                              # (Q, H)
    wq1aT = wq1[S + H:].T.astype(bf16)                               # (Q, A)
    wq2T = params["wq2"].T.astype(bf16)                              # (Q, Q)
    wq3T = params["wq3"].T.astype(bf16)                              # (A, Q)

    # ---- biases packed as one (6*BPAD, 1) f32 column --------------------------
    def bseg(vec):
        v = vec.reshape(-1).astype(f32)
        return jnp.pad(v, (0, BPAD - v.shape[0]))

    bias_all = jnp.concatenate([
        bseg(jnp.concatenate([params["bh1"].reshape(-1),
                              params["ba1"].reshape(-1)])),
        bseg(params["ba2"]),
        bseg(N * params["bh2"]),
        bseg(params["bq1"]),
        bseg(params["bq2"]),
        bseg(params["bq3"]),
    ])[:, None]                                                      # (6*BPAD, 1)

    # ---- specs ----------------------------------------------------------------
    def dspec(d):
        return pl.BlockSpec((d, RB), lambda g: (0, g))

    def cspec(arr):
        return pl.BlockSpec(arr.shape, lambda g: (0,) * arr.ndim)

    consts = (w_enc1, wa2T, wh2T, wq1sT, wq1hT, wq1aT, wq2T, wq3T, bias_all)
    in_specs = [dspec(S_pad), dspec(HA)] + [cspec(c) for c in consts]

    out = pl.pallas_call(
        kernel,
        out_shape=jax.ShapeDtypeStruct((A, grid * RB), jnp.float32),
        grid_spec=pltpu.PrefetchScalarGridSpec(
            num_scalar_prefetch=0,
            grid=(grid,),
            in_specs=in_specs,
            out_specs=pl.BlockSpec((A, RB), lambda g: (0, g)),
        ),
        compiler_params=pltpu.CompilerParams(
            dimension_semantics=("parallel",)),
    )(stT, haT, *consts)

    # ---- un-transpose / un-pad the lane-dense (A, C) output --------------------
    out = out.reshape(A, grid, N, TB)
    out = jnp.transpose(out, (1, 3, 2, 0)).reshape(Bp, N, A)
    return out[:B].reshape(E, T, N, A)


# ---------------------------------------------------------------------------
# Pure-JAX f32 reference mirroring the PyTorch forward literally.
# ---------------------------------------------------------------------------
def qtran_q_alt_reference(state, hidden_states, actions, p):
    E, T, N, A = actions.shape
    H = hidden_states.shape[-1]

    ae = jnp.maximum(actions.reshape(-1, A) @ p["wa1"] + p["ba1"], 0.0)
    ae = ae @ p["wa2"] + p["ba2"]
    ae = ae.reshape(E, T, N, A)

    he = jnp.maximum(hidden_states.reshape(-1, H) @ p["wh1"] + p["bh1"], 0.0)
    he = he @ p["wh2"] + p["bh2"]
    he = he.reshape(E, T, N, H).sum(axis=-2)
    he = jnp.broadcast_to(he[:, :, None, :], (E, T, N, H))

    ae_rep = jnp.broadcast_to(ae.reshape(E, T, 1, N * A), (E, T, N, N * A))
    mask = 1.0 - jnp.eye(N, dtype=jnp.float32)
    mask = jnp.repeat(mask.reshape(-1, 1), A, axis=1).reshape(N, N * A)
    ae_m = (ae_rep * mask[None, None]).reshape(E, T, N, N, A).sum(axis=-2)

    x = jnp.concatenate([state, he, ae_m], axis=-1)
    q = jnp.maximum(x @ p["wq1"] + p["bq1"], 0.0)
    q = jnp.maximum(q @ p["wq2"] + p["bq2"], 0.0)
    q = q @ p["wq3"] + p["bq3"]
    return q


# ---------------------------------------------------------------------------
# Deterministic parameter construction (shapes follow the module's __init__).
# Weights are stored pre-transposed as (in_features, out_features).
# ---------------------------------------------------------------------------
def make_params(key, n_actions, rnn_hidden_dim, state_shape, n_agents,
                qtran_hidden_dim):
    q_input = state_shape + n_actions + rnn_hidden_dim + n_agents
    shapes = {
        "wa1": (n_actions, n_actions), "ba1": (1, n_actions),
        "wa2": (n_actions, n_actions), "ba2": (1, n_actions),
        "wh1": (rnn_hidden_dim, rnn_hidden_dim), "bh1": (1, rnn_hidden_dim),
        "wh2": (rnn_hidden_dim, rnn_hidden_dim), "bh2": (1, rnn_hidden_dim),
        "wq1": (q_input, qtran_hidden_dim), "bq1": (1, qtran_hidden_dim),
        "wq2": (qtran_hidden_dim, qtran_hidden_dim), "bq2": (1, qtran_hidden_dim),
        "wq3": (qtran_hidden_dim, n_actions), "bq3": (1, n_actions),
    }
    params = {}
    keys = jax.random.split(key, len(shapes))
    for k_rng, (name, shp) in zip(keys, sorted(shapes.items())):
        params[name] = (0.1 * jax.random.normal(k_rng, shp)).astype(jnp.float32)
    return params


if __name__ == "__main__":
    # Small args consistent with the module.
    n_agents = 3
    n_actions = 8
    rnn_hidden_dim = 32
    state_shape = 16
    qtran_hidden_dim = 32
    episode_num = 2
    max_episode_len = 8

    key = jax.random.PRNGKey(0)
    k_p, k_s, k_h, k_a = jax.random.split(key, 4)

    params = make_params(k_p, n_actions, rnn_hidden_dim, state_shape,
                         n_agents, qtran_hidden_dim)

    # q_input = state_shape + n_actions + rnn_hidden_dim + n_agents, so the
    # `state` tensor fed to forward() carries state_shape + n_agents features
    # (state concatenated with the agent one-hot id upstream).
    state = jax.random.normal(
        k_s, (episode_num, max_episode_len, n_agents, state_shape + n_agents),
        dtype=jnp.float32)
    hidden_states = jax.random.normal(
        k_h, (episode_num, max_episode_len, n_agents, rnn_hidden_dim),
        dtype=jnp.float32)
    actions = jax.random.normal(
        k_a, (episode_num, max_episode_len, n_agents, n_actions),
        dtype=jnp.float32)

    q = qtran_q_alt(state, hidden_states, actions, params)
    q = jax.block_until_ready(q)

    q_ref = qtran_q_alt_reference(state, hidden_states, actions, params)
    # bf16 MXU operands (f32 accumulation) -> slightly relaxed tolerance.
    np.testing.assert_allclose(np.asarray(q), np.asarray(q_ref),
                               rtol=5e-2, atol=5e-2)

    assert q.shape == (episode_num, max_episode_len, n_agents, n_actions)
    print("KERNEL_OK")
</pallas_src>

<mosaic_0001>
module attributes {stable_mosaic.version = 11 : i64} {
  func.func @kernel(%arg0: i32, %arg1: memref<32x384xbf16, #tpu.memory_space<vmem>>, %arg2: memref<40x384xbf16, #tpu.memory_space<vmem>>, %arg3: memref<40x40xbf16, #tpu.memory_space<vmem>>, %arg4: memref<8x8xbf16, #tpu.memory_space<vmem>>, %arg5: memref<32x32xbf16, #tpu.memory_space<vmem>>, %arg6: memref<32x32xbf16, #tpu.memory_space<vmem>>, %arg7: memref<32x32xbf16, #tpu.memory_space<vmem>>, %arg8: memref<32x8xbf16, #tpu.memory_space<vmem>>, %arg9: memref<32x32xbf16, #tpu.memory_space<vmem>>, %arg10: memref<8x32xbf16, #tpu.memory_space<vmem>>, %arg11: memref<240x1xf32, #tpu.memory_space<vmem>>, %arg12: memref<8x384xf32, #tpu.memory_space<vmem>>) attributes {dimension_semantics = [#tpu.dimension_semantics<parallel>], iteration_bounds = array<i64: 1>, scalar_prefetch = 0 : i64, scratch_operands = 0 : i64, tpu.core_type = #tpu.core_type<tc>, window_params = [{transform_indices = @transform_0, window_bounds = array<i64: 32, 384>}, {transform_indices = @transform_1, window_bounds = array<i64: 40, 384>}, {pipeline_mode = #tpu.pipeline_mode<synchronous>, transform_indices = @transform_2, window_bounds = array<i64: 40, 40>}, {pipeline_mode = #tpu.pipeline_mode<synchronous>, transform_indices = @transform_3, window_bounds = array<i64: 8, 8>}, {pipeline_mode = #tpu.pipeline_mode<synchronous>, transform_indices = @transform_4, window_bounds = array<i64: 32, 32>}, {pipeline_mode = #tpu.pipeline_mode<synchronous>, transform_indices = @transform_5, window_bounds = array<i64: 32, 32>}, {pipeline_mode = #tpu.pipeline_mode<synchronous>, transform_indices = @transform_6, window_bounds = array<i64: 32, 32>}, {pipeline_mode = #tpu.pipeline_mode<synchronous>, transform_indices = @transform_7, window_bounds = array<i64: 32, 8>}, {pipeline_mode = #tpu.pipeline_mode<synchronous>, transform_indices = @transform_8, window_bounds = array<i64: 32, 32>}, {pipeline_mode = #tpu.pipeline_mode<synchronous>, transform_indices = @transform_9, window_bounds = array<i64: 8, 32>}, {pipeline_mode = #tpu.pipeline_mode<synchronous>, transform_indices = @transform_10, window_bounds = array<i64: 240, 1>}, {transform_indices = @transform_11, window_bounds = array<i64: 8, 384>}]} {
    %c0 = arith.constant 0 : index
    %c0_0 = arith.constant 0 : index
    %0 = vector.load %arg11[%c0, %c0_0] : memref<240x1xf32, #tpu.memory_space<vmem>>, vector<40x1xf32>
    %c40 = arith.constant 40 : index
    %c0_1 = arith.constant 0 : index
    %1 = vector.load %arg11[%c40, %c0_1] : memref<240x1xf32, #tpu.memory_space<vmem>>, vector<8x1xf32>
    %c80 = arith.constant 80 : index
    %c0_2 = arith.constant 0 : index
    %2 = vector.load %arg11[%c80, %c0_2] : memref<240x1xf32, #tpu.memory_space<vmem>>, vector<32x1xf32>
    %c120 = arith.constant 120 : index
    %c0_3 = arith.constant 0 : index
    %3 = vector.load %arg11[%c120, %c0_3] : memref<240x1xf32, #tpu.memory_space<vmem>>, vector<32x1xf32>
    %c160 = arith.constant 160 : index
    %c0_4 = arith.constant 0 : index
    %4 = vector.load %arg11[%c160, %c0_4] : memref<240x1xf32, #tpu.memory_space<vmem>>, vector<32x1xf32>
    %c200 = arith.constant 200 : index
    %c0_5 = arith.constant 0 : index
    %5 = vector.load %arg11[%c200, %c0_5] : memref<240x1xf32, #tpu.memory_space<vmem>>, vector<8x1xf32>
    %c0_6 = arith.constant 0 : index
    %c0_7 = arith.constant 0 : index
    %6 = vector.load %arg3[%c0_6, %c0_7] : memref<40x40xbf16, #tpu.memory_space<vmem>>, vector<40x40xbf16>
    %c0_8 = arith.constant 0 : index
    %c0_9 = arith.constant 0 : index
    %7 = vector.load %arg2[%c0_8, %c0_9] : memref<40x384xbf16, #tpu.memory_space<vmem>>, vector<40x384xbf16>
    %cst = arith.constant dense<0.000000e+00> : vector<40x384xf32>
    %8 = tpu.matmul %6, %7, %cst {dimension_numbers = #tpu.dot_dimension_numbers<[1], [0], [0], [1], [0, 0, 1, 1], [], []>} : vector<40x40xbf16>, vector<40x384xbf16>, vector<40x384xf32> -> vector<40x384xf32>
    %9 = vector.broadcast %0 : vector<40x1xf32> to vector<40x384xf32>
    %10 = arith.addf %8, %9 : vector<40x384xf32>
    %cst_10 = arith.constant 0.000000e+00 : f32
    %11 = vector.broadcast %cst_10 : f32 to vector<40x384xf32>
    %12 = arith.maximumf %10, %11 : vector<40x384xf32>
    %13 = vector.extract_strided_slice %12 {offsets = [0, 0], sizes = [32, 384], strides = [1, 1]} : vector<40x384xf32> to vector<32x384xf32>
    %14 = vector.extract_strided_slice %12 {offsets = [32, 0], sizes = [8, 384], strides = [1, 1]} : vector<40x384xf32> to vector<8x384xf32>
    %15 = vector.extract_strided_slice %13 {offsets = [0, 0], sizes = [32, 128], strides = [1, 1]} : vector<32x384xf32> to vector<32x128xf32>
    %16 = vector.extract_strided_slice %13 {offsets = [0, 128], sizes = [32, 128], strides = [1, 1]} : vector<32x384xf32> to vector<32x128xf32>
    %17 = arith.addf %15, %16 : vector<32x128xf32>
    %18 = vector.extract_strided_slice %13 {offsets = [0, 256], sizes = [32, 128], strides = [1, 1]} : vector<32x384xf32> to vector<32x128xf32>
    %19 = arith.addf %17, %18 : vector<32x128xf32>
    %c0_11 = arith.constant 0 : index
    %c0_12 = arith.constant 0 : index
    %20 = vector.load %arg5[%c0_11, %c0_12] : memref<32x32xbf16, #tpu.memory_space<vmem>>, vector<32x32xbf16>
    %21 = arith.truncf %19 : vector<32x128xf32> to vector<32x128xbf16>
    %cst_13 = arith.constant dense<0.000000e+00> : vector<32x128xf32>
    %22 = tpu.matmul %20, %21, %cst_13 {dimension_numbers = #tpu.dot_dimension_numbers<[1], [0], [0], [1], [0, 0, 1, 1], [], []>} : vector<32x32xbf16>, vector<32x128xbf16>, vector<32x128xf32> -> vector<32x128xf32>
    %23 = vector.broadcast %2 : vector<32x1xf32> to vector<32x128xf32>
    %24 = arith.addf %22, %23 : vector<32x128xf32>
    %c0_14 = arith.constant 0 : index
    %c0_15 = arith.constant 0 : index
    %25 = vector.load %arg4[%c0_14, %c0_15] : memref<8x8xbf16, #tpu.memory_space<vmem>>, vector<8x8xbf16>
    %26 = arith.truncf %14 : vector<8x384xf32> to vector<8x384xbf16>
    %cst_16 = arith.constant dense<0.000000e+00> : vector<8x384xf32>
    %27 = tpu.matmul %25, %26, %cst_16 {dimension_numbers = #tpu.dot_dimension_numbers<[1], [0], [0], [1], [0, 0, 1, 1], [], []>} : vector<8x8xbf16>, vector<8x384xbf16>, vector<8x384xf32> -> vector<8x384xf32>
    %28 = vector.broadcast %1 : vector<8x1xf32> to vector<8x384xf32>
    %29 = arith.addf %27, %28 : vector<8x384xf32>
    %30 = arith.truncf %29 : vector<8x384xf32> to vector<8x384xbf16>
    %31 = arith.truncf %24 : vector<32x128xf32> to vector<32x128xbf16>
    %c0_17 = arith.constant 0 : index
    %c0_18 = arith.constant 0 : index
    %32 = vector.load %arg8[%c0_17, %c0_18] : memref<32x8xbf16, #tpu.memory_space<vmem>>, vector<32x8xbf16>
    %cst_19 = arith.constant dense<0.000000e+00> : vector<32x384xf32>
    %33 = tpu.matmul %32, %30, %cst_19 {dimension_numbers = #tpu.dot_dimension_numbers<[1], [0], [0], [1], [0, 0, 1, 1], [], []>} : vector<32x8xbf16>, vector<8x384xbf16>, vector<32x384xf32> -> vector<32x384xf32>
    %c0_20 = arith.constant 0 : index
    %c0_21 = arith.constant 0 : index
    %34 = vector.load %arg7[%c0_20, %c0_21] : memref<32x32xbf16, #tpu.memory_space<vmem>>, vector<32x32xbf16>
    %cst_22 = arith.constant dense<0.000000e+00> : vector<32x128xf32>
    %35 = tpu.matmul %34, %31, %cst_22 {dimension_numbers = #tpu.dot_dimension_numbers<[1], [0], [0], [1], [0, 0, 1, 1], [], []>} : vector<32x32xbf16>, vector<32x128xbf16>, vector<32x128xf32> -> vector<32x128xf32>
    %c0_23 = arith.constant 0 : index
    %c0_24 = arith.constant 0 : index
    %36 = vector.load %arg6[%c0_23, %c0_24] : memref<32x32xbf16, #tpu.memory_space<vmem>>, vector<32x32xbf16>
    %c0_25 = arith.constant 0 : index
    %c0_26 = arith.constant 0 : index
    %37 = vector.load %arg1[%c0_25, %c0_26] : memref<32x384xbf16, #tpu.memory_space<vmem>>, vector<32x384xbf16>
    %cst_27 = arith.constant dense<0.000000e+00> : vector<32x384xf32>
    %38 = tpu.matmul %36, %37, %cst_27 {dimension_numbers = #tpu.dot_dimension_numbers<[1], [0], [0], [1], [0, 0, 1, 1], [], []>} : vector<32x32xbf16>, vector<32x384xbf16>, vector<32x384xf32> -> vector<32x384xf32>
    %39 = vector.extract_strided_slice %33 {offsets = [0, 0], sizes = [32, 128], strides = [1, 1]} : vector<32x384xf32> to vector<32x128xf32>
    %40 = vector.extract_strided_slice %33 {offsets = [0, 128], sizes = [32, 128], strides = [1, 1]} : vector<32x384xf32> to vector<32x128xf32>
    %41 = arith.addf %39, %40 : vector<32x128xf32>
    %42 = vector.extract_strided_slice %33 {offsets = [0, 256], sizes = [32, 128], strides = [1, 1]} : vector<32x384xf32> to vector<32x128xf32>
    %43 = arith.addf %41, %42 : vector<32x128xf32>
    %44 = arith.addf %35, %43 : vector<32x128xf32>
    %45 = tpu.concatenate %44, %44, %44 in 1 : vector<32x128xf32>, vector<32x128xf32>, vector<32x128xf32> -> vector<32x384xf32>
    %46 = arith.addf %38, %45 : vector<32x384xf32>
    %47 = arith.subf %46, %33 : vector<32x384xf32>
    %48 = vector.broadcast %3 : vector<32x1xf32> to vector<32x384xf32>
    %49 = arith.addf %47, %48 : vector<32x384xf32>
    %cst_28 = arith.constant 0.000000e+00 : f32
    %50 = vector.broadcast %cst_28 : f32 to vector<32x384xf32>
    %51 = arith.maximumf %49, %50 : vector<32x384xf32>
    %c0_29 = arith.constant 0 : index
    %c0_30 = arith.constant 0 : index
    %52 = vector.load %arg9[%c0_29, %c0_30] : memref<32x32xbf16, #tpu.memory_space<vmem>>, vector<32x32xbf16>
    %53 = arith.truncf %51 : vector<32x384xf32> to vector<32x384xbf16>
    %cst_31 = arith.constant dense<0.000000e+00> : vector<32x384xf32>
    %54 = tpu.matmul %52, %53, %cst_31 {dimension_numbers = #tpu.dot_dimension_numbers<[1], [0], [0], [1], [0, 0, 1, 1], [], []>} : vector<32x32xbf16>, vector<32x384xbf16>, vector<32x384xf32> -> vector<32x384xf32>
    %55 = vector.broadcast %4 : vector<32x1xf32> to vector<32x384xf32>
    %56 = arith.addf %54, %55 : vector<32x384xf32>
    %cst_32 = arith.constant 0.000000e+00 : f32
    %57 = vector.broadcast %cst_32 : f32 to vector<32x384xf32>
    %58 = arith.maximumf %56, %57 : vector<32x384xf32>
    %c0_33 = arith.constant 0 : index
    %c0_34 = arith.constant 0 : index
    %59 = vector.load %arg10[%c0_33, %c0_34] : memref<8x32xbf16, #tpu.memory_space<vmem>>, vector<8x32xbf16>
    %60 = arith.truncf %58 : vector<32x384xf32> to vector<32x384xbf16>
    %cst_35 = arith.constant dense<0.000000e+00> : vector<8x384xf32>
    %61 = tpu.matmul %59, %60, %cst_35 {dimension_numbers = #tpu.dot_dimension_numbers<[1], [0], [0], [1], [0, 0, 1, 1], [], []>} : vector<8x32xbf16>, vector<32x384xbf16>, vector<8x384xf32> -> vector<8x384xf32>
    %62 = vector.broadcast %5 : vector<8x1xf32> to vector<8x384xf32>
    %63 = arith.addf %61, %62 : vector<8x384xf32>
    %c0_36 = arith.constant 0 : index
    %c0_37 = arith.constant 0 : index
    %64 = vector.load %arg12[%c0_36, %c0_37] : memref<8x384xf32, #tpu.memory_space<vmem>>, vector<8x384xf32>
    tpu.vector_store %arg12[%c0_36, %c0_37], %63 {strides = array<i32>} : memref<8x384xf32, #tpu.memory_space<vmem>>, vector<8x384xf32>,
    return
  }
  func.func @transform_0(%arg0: i32) -> (i32, i32) {
    %c0_i32 = arith.constant 0 : i32
    %c0_i32_0 = arith.constant 0 : i32
    return %c0_i32, %arg0 : i32, i32
  }
  func.func @transform_1(%arg0: i32) -> (i32, i32) {
    %c0_i32 = arith.constant 0 : i32
    %c0_i32_0 = arith.constant 0 : i32
    return %c0_i32, %arg0 : i32, i32
  }
  func.func @transform_2(%arg0: i32) -> (i32, i32) {
    %c0_i32 = arith.constant 0 : i32
    %c0_i32_0 = arith.constant 0 : i32
    %c0_i32_1 = arith.constant 0 : i32
    return %c0_i32, %c0_i32_0 : i32, i32
  }
  func.func @transform_3(%arg0: i32) -> (i32, i32) {
    %c0_i32 = arith.constant 0 : i32
    %c0_i32_0 = arith.constant 0 : i32
    %c0_i32_1 = arith.constant 0 : i32
    return %c0_i32, %c0_i32_0 : i32, i32
  }
  func.func @transform_4(%arg0: i32) -> (i32, i32) {
    %c0_i32 = arith.constant 0 : i32
    %c0_i32_0 = arith.constant 0 : i32
    %c0_i32_1 = arith.constant 0 : i32
    return %c0_i32, %c0_i32_0 : i32, i32
  }
  func.func @transform_5(%arg0: i32) -> (i32, i32) {
    %c0_i32 = arith.constant 0 : i32
    %c0_i32_0 = arith.constant 0 : i32
    %c0_i32_1 = arith.constant 0 : i32
    return %c0_i32, %c0_i32_0 : i32, i32
  }
  func.func @transform_6(%arg0: i32) -> (i32, i32) {
    %c0_i32 = arith.constant 0 : i32
    %c0_i32_0 = arith.constant 0 : i32
    %c0_i32_1 = arith.constant 0 : i32
    return %c0_i32, %c0_i32_0 : i32, i32
  }
  func.func @transform_7(%arg0: i32) -> (i32, i32) {
    %c0_i32 = arith.constant 0 : i32
    %c0_i32_0 = arith.constant 0 : i32
    %c0_i32_1 = arith.constant 0 : i32
    return %c0_i32, %c0_i32_0 : i32, i32
  }
  func.func @transform_8(%arg0: i32) -> (i32, i32) {
    %c0_i32 = arith.constant 0 : i32
    %c0_i32_0 = arith.constant 0 : i32
    %c0_i32_1 = arith.constant 0 : i32
    return %c0_i32, %c0_i32_0 : i32, i32
  }
  func.func @transform_9(%arg0: i32) -> (i32, i32) {
    %c0_i32 = arith.constant 0 : i32
    %c0_i32_0 = arith.constant 0 : i32
    %c0_i32_1 = arith.constant 0 : i32
    return %c0_i32, %c0_i32_0 : i32, i32
  }
  func.func @transform_10(%arg0: i32) -> (i32, i32) {
    %c0_i32 = arith.constant 0 : i32
    %c0_i32_0 = arith.constant 0 : i32
    %c0_i32_1 = arith.constant 0 : i32
    return %c0_i32, %c0_i32_0 : i32, i32
  }
  func.func @transform_11(%arg0: i32) -> (i32, i32) {
    %c0_i32 = arith.constant 0 : i32
    %c0_i32_0 = arith.constant 0 : i32
    return %c0_i32, %arg0 : i32, i32
  }
}

</mosaic_0001>

<bundles_post_ra>
// kernel: tpu_custom_call.1
= control target key start
LH: loop header
LB: loop body
LE: loop exit
PB: predicated region body
PF: predicated region fallthrough
CT: control target
= control target key end

     0   :  { %vm162_vm0 = vcmask 1043456   ;;  %v1429_v3 = vmov 0.0   ;;  %v1430_v6 = vmov 0   ;;  %vm1431_vm1 = vmmov 0   ;;  %s1754_s0 = inlined_call_operand.vmem [shape: bf16[32,384], index: 0, kind: input, shape index: {}]   ;;  %s1755_s1 = inlined_call_operand.vmem [shape: bf16[40,384], index: 1, kind: input, shape index: {}]   ;;  %s1756_s2 = inlined_call_operand.vmem [shape: bf16[40,40], index: 2, kind: input, shape index: {}]   ;;  %s1757_s3 = inlined_call_operand.vmem [shape: bf16[8,8], index: 3, kind: input, shape index: {}]   ;;  %s1758_s4 = inlined_call_operand.vmem [shape: bf16[32,32], index: 4, kind: input, shape index: {}]   ;;  %s1759_s5 = inlined_call_operand.vmem [shape: bf16[32,32], index: 5, kind: input, shape index: {}]   ;;  %s1760_s6 = inlined_call_operand.vmem [shape: bf16[32,32], index: 6, kind: input, shape index: {}]   ;;  %s1761_s7 = inlined_call_operand.vmem [shape: bf16[32,8], index: 7, kind: input, shape index: {}]   ;;  %s1762_s8 = inlined_call_operand.vmem [shape: bf16[32,32], index: 8, kind: input, shape index: {}]   ;;  %s1763_s9 = inlined_call_operand.vmem [shape: bf16[8,32], index: 9, kind: input, shape index: {}]   ;;  %s1764_s10 = inlined_call_operand.vmem [shape: f32[240,1], index: 10, kind: input, shape index: {}]   ;;  %s1765_s11 = inlined_call_operand.hbm [shape: f32[8,384], index: 11, kind: output, shape index: {}]  }
   0x1   :  { %v72_v0 = vld [vmem:[%s1755_s1 + $0x30] sm:$0xff]  ;;  %1298 = vmatprep.subr.bf16.mxu1 %v1429_v3  ;;  %v1377_v4 = vld [vmem:[%s1755_s1 + $0x38] ss:$0 sps:$4 sm:$0xff]   ;;  %v1378_v5 = vld [vmem:[%s1755_s1 + $0x1c] ss:$12 sps:$4 sm:$0xff]   ;;  %204 = vmatprep.mubr.bf16.mxu0 %v1430_v6  ;;  %vm152_vm2 = vcmask 326656  }
   0x2   :  { %v1221_v1 = vcombine.high %v72_v0, %v72_v0  ;;  %v1220_v2 = vcombine.low %v72_v0, %v72_v0  ;;  %1373 = vset.pattern.permute.xlu0 %v1430_v6  ;;  %v170_v8 = vsel %vm162_vm0, %v1377_v4, 0  ;;  %1374 = vset.pattern.permute.xlu1 %v1430_v6  ;;  %v1380_v9 = vld [vmem:[%s1755_s1 + $0x18] ss:$12 sps:$4 sm:$0xff]   ;;  %v1381_v10 = vld [vmem:[%s1755_s1 + $0x20] ss:$12 sps:$4 sm:$0xff]   ;;  %v42_v17 = vld [vmem:[%s1764_s10 + $0x10] sm:$0xff] }
   0x3   :  { %1299 = vmatpush3.bf16.msra.mxu1 %v170_v8  ;;  %v1382_v11 = vld [vmem:[%s1755_s1 + $0x4] ss:$12 sps:$4 sm:$0xff]   ;;  %1304 = vmatprep.mubr.msk.bf16.mxu1 %vm1431_vm1, %v1429_v3  ;;  %v1384_v12 = vld [vmem:[%s1755_s1] ss:$12 sps:$4 sm:$0xff]   ;;  %v1385_v13 = vld [vmem:[%s1755_s1 + $0x8] ss:$12 sps:$4 sm:$0xff]  }
   0x4   :  { %1223 = vmatprep.subr.msk.bf16.mxu0 %vm162_vm0, %v1221_v1  ;;  %v164_v7 = vsel %vm162_vm0, %v1220_v2, 0  ;;  %1300 = vmatprep.subr.bf16.mxu1 %v1429_v3  ;;  %v44_v14 = vld [vmem:[%s1764_s10 + $0x20] sm:$0xff]  ;;  %v43_v15 = vld [vmem:[%s1764_s10 + $0x18] sm:$0xff]  ;;  %v41_v19 = vld [vmem:[%s1764_s10 + $0x8] sm:$0xff] }
   0x5   :  { %183 = vmatpush1.bf16.msra.mxu0 %v164_v7  ;;  %96 = vperm.xlu0 %1373, %v44_v14   ;;  %v1386_v16 = vld [vmem:[%s1756_s2] sm:$0xff]   ;;  %v45_v20 = vld [vmem:[%s1764_s10 + $0x28] sm:$0xff]  ;;  %v46_v24 = vld [vmem:[%s1764_s10 + $0x50] sm:$0xff] }
   0x6   :  { %184 = vmatprep.subr.bf16.mxu0 %v1378_v5  ;;  %91 = vperm.xlu1 %1374, %v43_v15   ;;  %v40_v18 = vld [vmem:[%s1764_s10] sm:$0xff]  ;;  %v1387_v21 = vld [vmem:[%s1756_s2 + $0x8] sm:$0xff]   ;;  %v47_v25 = vld [vmem:[%s1764_s10 + $0x58] sm:$0xff] }
   0x7   :  { %1301 = vmatpush3.bf16.msra.mxu1 %v1381_v10  ;;  %v48_v22 = vld [vmem:[%s1764_s10 + $0x60] sm:$0xff]  ;;  %v49_v23 = vld [vmem:[%s1764_s10 + $0x68] sm:$0xff] }
   0x8   :  { %1302 = vmatprep.subr.bf16.mxu1 %v1429_v3 }
   0x9   :  { %185 = vmatpush1.bf16.msra.mxu0 %v1380_v9  ;;  %86 = vperm.xlu0 %1373, %v42_v17  }
   0xa   :  { %186 = vmatprep.subr.bf16.mxu0 %v1382_v11  ;;  %76 = vperm.xlu1 %1374, %v40_v18  }
   0xb   :  { %1303 = vmatpush3.bf16.msra.mxu1 %v1385_v13 }
   0xd   :  { %187 = vmatpush1.bf16.msra.mxu0 %v1384_v12  ;;  %81 = vperm.xlu0 %1373, %v41_v19  }
   0xe   :  { %1305 = vmatmul.mubr.msk.bf16.vlgmr.msra.gmra.mxu1 %vm152_vm2, %v1386_v16  ;;  %410 = vperm.xlu1 %1374, %v45_v20  }
   0xf   :  { %1308 = vmatprep.mubr.msk.bf16.mxu1 %vm1431_vm1, %v1429_v3 }
  0x10   :  { %1224 = vmatmul.mubr.msk.bf16.vlgmr.msra.gmra.mxu0 %vm152_vm2, %v1386_v16 }
  0x11   :  { %214 = vmatprep.mubr.bf16.mxu0 %v1430_v6  ;;  %330 = vperm.xlu0 %1373, %v48_v22  }
  0x12   :  { %335 = vperm.xlu1 %1374, %v49_v23  }
  0x16   :  { %1309 = vmatmul.mubr.msk.bf16.gmra.mxu1 %vm152_vm2, %v1387_v21 }
  0x17   :  { %1312 = vmatprep.mubr.msk.bf16.mxu1 %vm1431_vm1, %v1429_v3 }
  0x18   :  { %1225 = vmatmul.mubr.msk.bf16.gmra.mxu0 %vm152_vm2, %v1387_v21 }
  0x19   :  { %224 = vmatprep.mubr.bf16.mxu0 %v1430_v6 }
  0x1a   :  { %16 = vsyncpa [#allocation3], 0  ;;  %320 = vperm.xlu0 %1373, %v46_v24   ;;  %325 = vperm.xlu1 %1374, %v47_v25   ;;  %v1388_v26 = vld [vmem:[%s1756_s2 + $0x10] ss:$0 sps:$4 sm:$0xff]   ;;  %v52_v27 = vld [vmem:[%s1764_s10 + $0x88] sm:$0xff]  ;;  %vm348_vm3 = vcmask 261120  }
  0x1b   :  { %v53_v28 = vld [vmem:[%s1764_s10 + $0x90] sm:$0xff]  ;;  %v50_v29 = vld [vmem:[%s1764_s10 + $0x78] sm:$0xff]  ;;  %v51_v30 = vld [vmem:[%s1764_s10 + $0x80] sm:$0xff]  ;;  %vm413_vm4 = vcmask 64512  }
  0x1c   :  { %v56_v31 = vld [vmem:[%s1764_s10 + $0xb0] sm:$0xff]  ;;  %v57_v32 = vld [vmem:[%s1764_s10 + $0xb8] sm:$0xff]  ;;  %v54_v33 = vld [vmem:[%s1764_s10 + $0xa0] sm:$0xff] }
  0x1d   :  { %v55_v34 = vld [vmem:[%s1764_s10 + $0xa8] sm:$0xff]  ;;  %v1389_v36 = vld [vmem:[%s1758_s4] sm:$0xff]  }
  0x1e   :  { %906 = vperm.xlu0 %1373, %v52_v27   ;;  %911 = vperm.xlu1 %1374, %v53_v28   ;;  %v58_v35 = vld [vmem:[%s1764_s10 + $0xc8] sm:$0xff] }
  0x1f   :  { %1313 = vmatmul.mubr.msk.bf16.gmra.mxu1 %vm152_vm2, %v1388_v26 }
  0x20   :  { %1226 = vmatmul.mubr.msk.bf16.gmra.mxu0 %vm152_vm2, %v1388_v26  ;;  %458 = vmatprep.mubr.bf16.mxu1 %v1430_v6 }
  0x21   :  { %1320 = vmatprep.mubr.msk.bf16.mxu0 %vm348_vm3, %v1389_v36 }
  0x22   :  { %896 = vperm.xlu0 %1373, %v50_v29   ;;  %901 = vperm.xlu1 %1374, %v51_v30  }
  0x26   :  { %960 = vperm.xlu0 %1373, %v56_v31   ;;  %965 = vperm.xlu1 %1374, %v57_v32  }
  0x2a   :  { %950 = vperm.xlu0 %1373, %v54_v33   ;;  %955 = vperm.xlu1 %1374, %v55_v34  }
  0x2e   :  { %1107 = vperm.xlu0 %1373, %v58_v35  }
  0x80   :  { %v1611_v37 = vpop.permute.xlu0 %96 }
  0x81   :  { %v92_v43 = vpop.permute.xlu1 %91 }
  0x84   :  { %v87_v40 = vpop.permute.xlu0 %86 }
  0x85   :  { %v77_v52 = vpop.permute.xlu1 %76 }
  0x88   :  { %v82_v48 = vpop.permute.xlu0 %81 }
  0xce   :  { %v267_v39 = vpop.f32.mrf.mxu1 }
  0xcf   :  { %v268_v5 = vadd.f32 %v267_v39, %v77_v52 }
  0xd0   :  { %v206_v38 = vpop.f32.mrf.mxu0  ;;  %v1306_v42 = vpop.f32.mrf.mxu1 }
  0xd1   :  { %v207_v57 = vadd.f32 %v206_v38, %v77_v52  ;;  %v291_v24 = vmax.f32 %v268_v5, 0.0 }
  0xd2   :  { %v208_v41 = vpop.f32.mrf.mxu0  ;;  %v270_v45 = vpop.f32.mrf.mxu1 }
  0xd3   :  { %v209_v58 = vadd.f32 %v208_v41, %v77_v52  ;;  %v271_v61 = vadd.f32 %v270_v45, %v82_v48  ;;  %v289_v11 = vmax.f32 %v207_v57, 0.0  ;;  %v411_v52 = vpop.permute.xlu1 %410 }
  0xd4   :  { %v210_v44 = vpop.f32.mrf.mxu0  ;;  %v1307_v47 = vpop.f32.mrf.mxu1 }
  0xd5   :  { %v211_v53 = vadd.f32 %v210_v44, %v82_v48  ;;  %v290_v12 = vmax.f32 %v209_v58, 0.0  ;;  %v294_v15 = vmax.f32 %v271_v61, 0.0  ;;  %v1395_v61 = vld [vmem:[%s1754_s0 + $0x1c] ss:$12 sps:$4 sm:$0xff]  }
  0xd6   :  { %v212_v46 = vpop.f32.mrf.mxu0  ;;  %v275_v51 = vpop.f32.mrf.mxu1 }
  0xd7   :  { %v213_v49 = vadd.f32 %v212_v46, %v82_v48  ;;  %v276_v62 = vadd.f32 %v275_v51, %v87_v40  ;;  %v292_v7 = vmax.f32 %v211_v53, 0.0  ;;  %v304_v27 = vadd.f32 %v290_v12, %v289_v11  ;;  %v404_v48 = vld [vmem:[%s1757_s3] sm:$0xf]  ;;  %v336_v5 = vpop.permute.xlu1 %335 }
  0xd8   :  { %v216_v50 = vpop.f32.mrf.mxu0  ;;  %v1310_v56 = vpop.f32.mrf.mxu1  ;;  %v1391_v51 = vld [vmem:[%s1761_s7] sm:$0xff]  }
  0xd9   :  { %v217_v54 = vadd.f32 %v216_v50, %v87_v40  ;;  %v293_v60 = vmax.f32 %v213_v49, 0.0  ;;  %v297_v17 = vmax.f32 %v276_v62, 0.0  ;;  %v308_v42 = vadd.f32 %v304_v27, %v291_v24  ;;  %v1390_v49 = vld [vmem:[%s1758_s4 + $0x8] sm:$0xff]   ;;  %v1399_v27 = vld [vmem:[%s1759_s5] sm:$0xff]  }
  0xda   :  { %v218_v55 = vpop.f32.mrf.mxu0  ;;  %v278_v0 = vpop.f32.mrf.mxu1 }
  0xdb   :  { %v219_v59 = vadd.f32 %v218_v55, %v87_v40  ;;  %v279_v4 = vadd.f32 %v278_v0, %v92_v43  ;;  %v295_v8 = vmax.f32 %v217_v54, 0.0  ;;  %v305_v14 = vadd.f32 %v293_v60, %v292_v7 }
  0xdc   :  { %v220_v63 = vpop.f32.mrf.mxu0  ;;  %v1311_v10 = vpop.f32.mrf.mxu1 }
  0xdd   :  { %v296_v1 = vmax.f32 %v219_v59, 0.0  ;;  %v221_v2 = vadd.f32 %v220_v63, %v92_v43  ;;  %v300_v22 = vmax.f32 %v279_v4, 0.0  ;;  %v309_v31 = vadd.f32 %v305_v14, %v294_v15  ;;  %v1398_v4 = vld [vmem:[%s1754_s0 + $0x4] ss:$12 sps:$4 sm:$0xff]   ;;  %v1396_v10 = vld [vmem:[%s1754_s0] ss:$12 sps:$4 sm:$0xff]  }
  0xde   :  { %v222_v9 = vpop.f32.mrf.mxu0 }
  0xdf   :  { %v223_v13 = vadd.f32 %v222_v9, %v92_v43  ;;  %v306_v16 = vadd.f32 %v296_v1, %v295_v8  ;;  %v283_v19 = vpop.f32.mrf.mxu1  ;;  %v298_v20 = vmax.f32 %v221_v2, 0.0  ;;  %v316_v47 = vpack.c.bf16 %v309_v31, %v308_v42  ;;  %v1393_v2 = vld [vmem:[%s1754_s0 + $0x18] ss:$12 sps:$4 sm:$0xff]   ;;  %v331_v8 = vpop.permute.xlu0 %330  ;;  %v1404_v31 = vld [vmem:[%s1759_s5 + $0x8] sm:$0xff]  }
  0xe0   :  { %v226_v18 = vpop.f32.mrf.mxu0  ;;  %v284_v39 = vadd.f32 %v283_v19, %v1611_v37 }
  0xe1   :  { %v299_v21 = vmax.f32 %v223_v13, 0.0  ;;  %v227_v23 = vadd.f32 %v226_v18, %v1611_v37  ;;  %v1314_v26 = vpop.f32.mrf.mxu1  ;;  %v310_v32 = vadd.f32 %v306_v16, %v297_v17  ;;  %v1392_v16 = vld [vmem:[%s1761_s7 + $0x8] sm:$0xff]   ;;  %v326_v17 = vpop.permute.xlu1 %325 }
  0xe2   :  { %v228_v25 = vpop.f32.mrf.mxu0  ;;  %v303_v45 = vmax.f32 %v284_v39, 0.0 }
  0xe3   :  { %v307_v28 = vadd.f32 %v299_v21, %v298_v20  ;;  %v301_v29 = vmax.f32 %v227_v23, 0.0  ;;  %v229_v30 = vadd.f32 %v228_v25, %v1611_v37  ;;  %v286_v34 = vpop.f32.mrf.mxu1  ;;  %v1400_v23 = vld [vmem:[%s1760_s6] sm:$0xff]  }
  0xe4   :  { %v230_v33 = vpop.f32.mrf.mxu0  ;;  %v407_v37 = vpack.c.bf16 %v303_v45, %v303_v45 }
  0xe5   :  { %v311_v35 = vadd.f32 %v307_v28, %v300_v22  ;;  %v405_v36 = vpack.c.bf16 %v301_v29, %v301_v29  ;;  %v302_v38 = vmax.f32 %v229_v30, 0.0  ;;  %v1315_v41 = vpop.f32.mrf.mxu1  ;;  %v321_v22 = vpop.permute.xlu0 %320  ;;  %v1402_v28 = vld [vmem:[%s1754_s0 + $0x20] ss:$12 sps:$4 sm:$0xff]   ;;  %v1403_v30 = vld [vmem:[%s1754_s0 + $0x8] ss:$12 sps:$4 sm:$0xff]  }
  0xe6   :  { %v231_v40 = vpop.f32.mrf.mxu0  ;;  %v424_v50 = vsel %vm162_vm0, %v407_v37, 0  ;;  %v1401_v29 = vld [vmem:[%s1760_s6 + $0x8] sm:$0xff]  }
  0xe7   :  { %v406_v43 = vpack.c.bf16 %v302_v38, %v302_v38  ;;  %v317_v44 = vpack.c.bf16 %v311_v35, %v310_v32  ;;  %v418_v46 = vsel %vm162_vm0, %v405_v36, 0  ;;  %v1689_v32 = vld [vmem:[%s1762_s8] sm:$0xff]  }
  0xe9   :  { %1316 = vmatprep.subr.bf16.mxu0 %v317_v44  ;;  %1234 = vmatprep.subr.msk.bf16.mxu1 %vm162_vm0, %v406_v43 }
  0xea   :  { %1317 = vmatpush3.bf16.msra.mxu0 %v317_v44  ;;  %441 = vmatpush1.bf16.msra.mxu1 %v418_v46 }
  0xeb   :  { %1318 = vmatprep.subr.bf16.mxu0 %v316_v47 }
  0xed   :  { %1235 = vmatmul.mubr.msk.bf16.vlgmr.msra.gmra.mxu1 %vm413_vm4, %v404_v48 }
  0xee   :  { %1319 = vmatpush3.bf16.msra.mxu0 %v316_v47  ;;  %573 = vmatprep.mubr.bf16.mxu1 %v1430_v6 }
  0xef   :  { %1324 = vmatprep.subr.bf16.mxu0 %v1429_v3 }
  0xf1   :  { %1321 = vmatmul.mubr.msk.bf16.vlgmr.msra.gmra.mxu0 %vm348_vm3, %v1390_v49 }
  0xf2   :  { %1325 = vmatpush3.bf16.msra.mxu0 %v424_v50  ;;  %1326 = vmatprep.mubr.msk.bf16.mxu0 %vm1431_vm1, %v1429_v3 }
  0xf9   :  { %1327 = vmatmul.mubr.msk.bf16.vlgmr.msra.gmra.mxu0 %vm413_vm4, %v404_v48 }
  0xfa   :  { %1332 = vmatprep.mubr.msk.bf16.mxu0 %vm413_vm4, %v1391_v51 }
 0x1ad   :  { %v460_v53 = vpop.f32.mrf.mxu1 }
 0x1ae   :  { %v461_v54 = vadd.f32 %v460_v53, %v411_v52 }
 0x1af   :  { %v462_v55 = vpop.f32.mrf.mxu1 }
 0x1b0   :  { %v507_v56 = vpack.c.bf16 %v461_v54, %v461_v54  ;;  %v463_v57 = vadd.f32 %v462_v55, %v411_v52 }
 0x1b1   :  { %v1322_v58 = vpop.f32.mrf.mxu0  ;;  %v464_v59 = vpop.f32.mrf.mxu1 }
 0x1b2   :  { %v508_v60 = vpack.c.bf16 %v463_v57, %v463_v57  ;;  %v533_v0 = vsel %vm162_vm0, %v507_v56, 0  ;;  %v398_v14 = vadd.f32 %v1322_v58, %v331_v8 }
 0x1b3   :  { %v389_v62 = vpop.f32.mrf.mxu0  ;;  %v465_v63 = vpop.f32.mrf.mxu1 }
 0x1b4   :  { %1239 = vmatprep.subr.msk.bf16.mxu1 %vm162_vm0, %v508_v60  ;;  %v390_v25 = vadd.f32 %v389_v62, %v321_v22  ;;  %v912_v63 = vpop.permute.xlu1 %911 }
 0x1b5   :  { %v1323_v1 = vpop.f32.mrf.mxu0  ;;  %556 = vmatpush1.bf16.msra.mxu1 %v533_v0 }
 0x1b6   :  { %792 = vmatprep.subr.bf16.mxu1 %v1395_v61  ;;  %v401_v11 = vadd.f32 %v1323_v1, %v336_v5 }
 0x1b7   :  { %v392_v7 = vpop.f32.mrf.mxu0 }
 0x1b8   :  { %1240 = vmatmul.mubr.msk.bf16.vlgmr.msra.gmra.mxu1 %vm413_vm4, %v1391_v51  ;;  %v511_v19 = vpack.c.bf16 %v401_v11, %v398_v14  ;;  %v393_v20 = vadd.f32 %v392_v7, %v326_v17  ;;  %v907_v7 = vpop.permute.xlu0 %906 }
 0x1b9   :  { %v501_v9 = vpop.f32.mrf.mxu0  ;;  %583 = vmatprep.mubr.bf16.mxu1 %v1430_v6  ;;  %793 = vmatpush1.bf16.msra.mxu1 %v1393_v2 }
 0x1ba   :  { %v502_v12 = vadd.f32 %v501_v9, %v411_v52  ;;  %794 = vmatprep.subr.bf16.mxu1 %v1398_v4  ;;  %v510_v26 = vpack.c.bf16 %v393_v20, %v390_v25 }
 0x1bb   :  { %v1328_v13 = vpop.f32.mrf.mxu0 }
 0x1bc   :  { %v509_v15 = vpack.c.bf16 %v502_v12, %v502_v12 }
 0x1bd   :  { %795 = vmatpush1.bf16.msra.mxu1 %v1396_v10  ;;  %v504_v18 = vpop.f32.mrf.mxu0 }
 0x1be   :  { %v539_v21 = vsel %vm162_vm0, %v509_v15, 0  ;;  %1368 = vmatprep.subr.msk.bf16.mxu0 %vm162_vm0, %v509_v15 }
 0x1bf   :  { %1331 = vmatpush3.bf16.msra.mxu0 %v539_v21  ;;  %v1329_v24 = vpop.f32.mrf.mxu0 }
 0x1c0   :  { %1241 = vmatmul.mubr.msk.bf16.gmra.mxu1 %vm413_vm4, %v1392_v16  ;;  %1336 = vmatprep.subr.bf16.mxu0 %v511_v19 }
 0x1c1   :  { %812 = vmatprep.mubr.bf16.mxu1 %v1430_v6 }
 0x1c2   :  { %1333 = vmatmul.mubr.msk.bf16.vlgmr.msra.gmra.mxu0 %vm413_vm4, %v1392_v16 }
 0x1c3   :  { %1337 = vmatpush3.bf16.msra.mxu0 %v511_v19  ;;  %1340 = vmatprep.mubr.msk.bf16.mxu0 %vm348_vm3, %v1400_v23 }
 0x1c4   :  { %1338 = vmatprep.subr.bf16.mxu0 %v510_v26 }
 0x1c7   :  { %1339 = vmatpush3.bf16.msra.mxu0 %v510_v26 }
 0x1c8   :  { %1256 = vmatmul.mubr.msk.bf16.vlgmr.msra.gmra.mxu1 %vm348_vm3, %v1399_v27  ;;  %1344 = vmatprep.subr.bf16.mxu0 %v1402_v28 }
 0x1c9   :  { %822 = vmatprep.mubr.bf16.mxu1 %v1430_v6 }
 0x1ca   :  { %1341 = vmatmul.mubr.msk.bf16.vlgmr.msra.gmra.mxu0 %vm348_vm3, %v1401_v29 }
 0x1cb   :  { %1345 = vmatpush3.bf16.msra.mxu0 %v1402_v28  ;;  %1348 = vmatprep.mubr.msk.bf16.mxu0 %vm348_vm3, %v1399_v27  ;;  %v902_v28 = vpop.permute.xlu1 %901 }
 0x1cc   :  { %1346 = vmatprep.subr.bf16.mxu0 %v1403_v30 }
 0x1cf   :  { %1347 = vmatpush3.bf16.msra.mxu0 %v1403_v30 }
 0x1d0   :  { %1257 = vmatmul.mubr.msk.bf16.gmra.mxu1 %vm348_vm3, %v1404_v31 }
 0x1d1   :  { %1356 = vmatprep.mubr.msk.bf16.mxu1 %vm348_vm3, %v1689_v32 }
 0x1d2   :  { %1349 = vmatmul.mubr.msk.bf16.vlgmr.msra.gmra.mxu0 %vm348_vm3, %v1404_v31 }
 0x1d3   :  { %1016 = vmatprep.mubr.bf16.mxu0 %v1430_v6 }
 0x278   :  { %v1693_v33 = vpop.f32.mrf.mxu1 }
 0x27a   :  { %v1695_v34 = vpop.f32.mrf.mxu1 }
 0x27b   :  { %v659_v49 = vadd.f32 %v1695_v34, %v1693_v33 }
 0x27c   :  { %v1697_v35 = vpop.f32.mrf.mxu1 }
 0x27e   :  { %v1699_v36 = vpop.f32.mrf.mxu1 }
 0x27f   :  { %v660_v52 = vadd.f32 %v1699_v36, %v1697_v35 }
 0x280   :  { %v1701_v38 = vpop.f32.mrf.mxu1 }
 0x282   :  { %v587_v39 = vpop.f32.mrf.mxu1  ;;  %v1703_v40 = vpop.f32.mrf.mxu0 }
 0x283   :  { %v661_v47 = vadd.f32 %v587_v39, %v1701_v38 }
 0x284   :  { %v589_v41 = vpop.f32.mrf.mxu1  ;;  %v1705_v42 = vpop.f32.mrf.mxu0 }
 0x285   :  { %v663_v53 = vadd.f32 %v659_v49, %v1705_v42  ;;  %v665_v55 = vadd.f32 %v1703_v40, %v661_v47 }
 0x286   :  { %v1707_v43 = vpop.f32.mrf.mxu1  ;;  %v1709_v44 = vpop.f32.mrf.mxu0 }
 0x287   :  { %v662_v54 = vadd.f32 %v1707_v43, %v589_v41 }
 0x288   :  { %v1711_v45 = vpop.f32.mrf.mxu0  ;;  %v814_v46 = vpop.f32.mrf.mxu1 }
 0x289   :  { %v664_v58 = vadd.f32 %v660_v52, %v1711_v45  ;;  %v666_v0 = vadd.f32 %v1709_v44, %v662_v54 }
 0x28a   :  { %v1342_v48 = vpop.f32.mrf.mxu0  ;;  %v816_v37 = vpop.f32.mrf.mxu1 }
 0x28b   :  { %v726_v60 = vadd.f32 %v1342_v48, %v665_v55  ;;  %v897_v48 = vpop.permute.xlu0 %896 }
 0x28c   :  { %v717_v50 = vpop.f32.mrf.mxu0  ;;  %v818_v51 = vpop.f32.mrf.mxu1 }
 0x28d   :  { %v718_v59 = vadd.f32 %v717_v50, %v663_v53 }
 0x28e   :  { %v1343_v56 = vpop.f32.mrf.mxu0  ;;  %v820_v57 = vpop.f32.mrf.mxu1 }
 0x28f   :  { %v817_v8 = vadd.f32 %v816_v37, %v718_v59  ;;  %v729_v9 = vadd.f32 %v1343_v56, %v666_v0  ;;  %v815_v16 = vadd.f32 %v814_v46, %v718_v59 }
 0x290   :  { %v720_v61 = vpop.f32.mrf.mxu0  ;;  %v824_v62 = vpop.f32.mrf.mxu1 }
 0x291   :  { %v721_v1 = vadd.f32 %v720_v61, %v664_v58  ;;  %v825_v2 = vadd.f32 %v824_v62, %v726_v60  ;;  %v883_v25 = vsub.f32 %v817_v8, %v1695_v34  ;;  %v882_v37 = vsub.f32 %v815_v16, %v1693_v33  ;;  %v1406_v8 = vld [vmem:[%s1762_s8 + $0x8] sm:$0xff]  }
 0x292   :  { %v826_v4 = vpop.f32.mrf.mxu1  ;;  %v1350_v5 = vpop.f32.mrf.mxu0 }
 0x293   :  { %v821_v10 = vadd.f32 %v820_v57, %v721_v1  ;;  %v819_v11 = vadd.f32 %v818_v51, %v721_v1  ;;  %v827_v12 = vadd.f32 %v826_v4, %v726_v60  ;;  %v876_v13 = vadd.f32 %v1350_v5, %v726_v60 }
 0x294   :  { %v828_v14 = vpop.f32.mrf.mxu1  ;;  %v867_v15 = vpop.f32.mrf.mxu0  ;;  %v888_v19 = vsub.f32 %v825_v2, %v1701_v38  ;;  %v915_v52 = vadd.f32 %v897_v48, %v883_v25  ;;  %v914_v58 = vadd.f32 %v897_v48, %v882_v37 }
 0x295   :  { %v886_v17 = vsub.f32 %v821_v10, %v1699_v36  ;;  %v829_v18 = vadd.f32 %v828_v14, %v729_v9  ;;  %v889_v20 = vsub.f32 %v827_v12, %v587_v39  ;;  %v890_v21 = vsub.f32 %v876_v13, %v1703_v40 }
 0x296   :  { %v868_v22 = vadd.f32 %v867_v15, %v718_v59  ;;  %v830_v23 = vpop.f32.mrf.mxu1  ;;  %v1351_v24 = vpop.f32.mrf.mxu0  ;;  %v885_v29 = vsub.f32 %v819_v11, %v1697_v35  ;;  %v920_v49 = vadd.f32 %v907_v7, %v888_v19 }
 0x297   :  { %v891_v26 = vsub.f32 %v829_v18, %v589_v41  ;;  %v831_v27 = vadd.f32 %v830_v23, %v729_v9  ;;  %v921_v30 = vadd.f32 %v907_v7, %v889_v20  ;;  %v879_v36 = vadd.f32 %v1351_v24, %v729_v9  ;;  %v961_v9 = vpop.permute.xlu0 %960  ;;  %v966_v11 = vpop.permute.xlu1 %965 }
 0x298   :  { %v884_v31 = vsub.f32 %v868_v22, %v1705_v42  ;;  %v870_v46 = vpop.f32.mrf.mxu0  ;;  %v918_v40 = vadd.f32 %v902_v28, %v886_v17  ;;  %v922_v34 = vadd.f32 %v907_v7, %v890_v21  ;;  %v917_v42 = vadd.f32 %v902_v28, %v885_v29 }
 0x299   :  { %v923_v47 = vadd.f32 %v912_v63, %v891_v26  ;;  %v892_v38 = vsub.f32 %v831_v27, %v1707_v43  ;;  %v871_v39 = vadd.f32 %v870_v46, %v721_v1  ;;  %v893_v41 = vsub.f32 %v879_v36, %v1709_v44 }
 0x29a   :  { %v916_v50 = vadd.f32 %v897_v48, %v884_v31  ;;  %v933_v55 = vmax.f32 %v921_v30, 0.0  ;;  %v930_v57 = vmax.f32 %v918_v40, 0.0  ;;  %v932_v59 = vmax.f32 %v920_v49, 0.0 }
 0x29b   :  { %v924_v51 = vadd.f32 %v912_v63, %v892_v38  ;;  %v887_v35 = vsub.f32 %v871_v39, %v1711_v45  ;;  %v935_v53 = vmax.f32 %v923_v47, 0.0  ;;  %v925_v54 = vadd.f32 %v912_v63, %v893_v41  ;;  %v951_v17 = vpop.permute.xlu0 %950  ;;  %v956_v20 = vpop.permute.xlu1 %955 }
 0x29c   :  { %v934_v60 = vmax.f32 %v922_v34, 0.0  ;;  %v928_v61 = vmax.f32 %v916_v50, 0.0  ;;  %v927_v44 = vmax.f32 %v915_v52, 0.0  ;;  %v929_v4 = vmax.f32 %v917_v42, 0.0  ;;  %v1098_v34 = vld [vmem:[%s1763_s9] sm:$0xf] }
 0x29d   :  { %v936_v56 = vmax.f32 %v924_v51, 0.0  ;;  %v919_v43 = vadd.f32 %v902_v28, %v887_v35  ;;  %v937_v33 = vmax.f32 %v925_v54, 0.0  ;;  %v945_v1 = vpack.c.bf16 %v935_v53, %v932_v59  ;;  %s1432_s9 = smov [#allocation2]  }
 0x29e   :  { %v943_v45 = vpack.c.bf16 %v930_v57, %v927_v44  ;;  %v926_v63 = vmax.f32 %v914_v58, 0.0  ;;  %s1203_s1 = sshll.u32 %s1432_s9, 4  ;;  %s1204_s1 = int_to_ptr.vmem [resolvable:$true] %s1203_s1 }
 0x29f   :  { %v931_v62 = vmax.f32 %v919_v43, 0.0  ;;  %v946_v0 = vpack.c.bf16 %v936_v56, %v933_v55  ;;  %v947_v2 = vpack.c.bf16 %v937_v33, %v934_v60  ;;  %v1108_v57 = vpop.permute.xlu0 %1107  ;;  %s1407_s4 = scalar_lea.vmem %s1204_s1, 384  ;;  %p1412_p1 = scmp.lt.s32.totalorder %s1204_s1, %s1204_s1 }
 0x2a0   :  { %v942_v7 = vpack.c.bf16 %v929_v4, %v926_v63  ;;  %p1408_p0 = scmp.ne.s32.totalorder %s1204_s1, %s1407_s4  ;;  %p1413_p2 = scmp.lt.s32.totalorder %s1407_s4, %s1407_s4 }
 0x2a1   :  { %996 = vmatprep.subr.bf16.mxu0 %v946_v0  ;;  %v944_v5 = vpack.c.bf16 %v931_v62, %v928_v61  ;;  %1352 = vmatprep.subr.bf16.mxu1 %v947_v2 }
 0x2a2   :  { %997 = vmatpush1.bf16.msra.mxu0 %v945_v1  ;;  %1353 = vmatpush3.bf16.msra.mxu1 %v947_v2  ;;  %p1414_p3 = por %p1413_p2, %p1412_p1 }
 0x2a3   :  { %998 = vmatprep.subr.bf16.mxu0 %v943_v45  ;;  %1354 = vmatprep.subr.bf16.mxu1 %v944_v5 }
 0x2a4   :  { %p1415_p4 = pnand %p1414_p3, %p1408_p0 }
 0x2a6   :  { %999 = vmatpush1.bf16.msra.mxu0 %v942_v7  ;;  %1355 = vmatpush3.bf16.msra.mxu1 %v944_v5 }
 0x2a7   :  { %1360 = vmatprep.subr.bf16.mxu0 %v1429_v3 }
 0x2a9   :  { %1262 = vmatmul.mubr.msk.bf16.vlgmr.msra.gmra.mxu0 %vm348_vm3, %v1689_v32  ;;  %1357 = vmatmul.mubr.msk.bf16.vlgmr.msra.gmra.mxu1 %vm348_vm3, %v1406_v8 }
 0x2aa   :  { %1026 = vmatprep.mubr.bf16.mxu0 %v1430_v6  ;;  %1145 = vmatprep.mubr.bf16.mxu1 %v1430_v6 }
 0x2b1   :  { %1263 = vmatmul.mubr.msk.bf16.gmra.mxu0 %vm348_vm3, %v1406_v8 }
 0x2b2   :  { %1364 = vmatprep.mubr.msk.bf16.mxu0 %vm1431_vm1, %v1429_v3 }
 0x369   :  { %v1018_v10 = vpop.f32.mrf.mxu0  ;;  %v1358_v12 = vpop.f32.mrf.mxu1 }
 0x36a   :  { %v1080_v15 = vadd.f32 %v1358_v12, %v961_v9  ;;  %v1019_v35 = vadd.f32 %v1018_v10, %v951_v17 }
 0x36b   :  { %v1020_v13 = vpop.f32.mrf.mxu0  ;;  %v1071_v14 = vpop.f32.mrf.mxu1 }
 0x36c   :  { %v1094_v6 = vmax.f32 %v1080_v15, 0.0  ;;  %v1072_v22 = vadd.f32 %v1071_v14, %v951_v17  ;;  %v1021_v40 = vadd.f32 %v1020_v13, %v951_v17  ;;  %v1086_v56 = vmax.f32 %v1019_v35, 0.0 }
 0x36d   :  { %v1022_v16 = vpop.f32.mrf.mxu0  ;;  %v1359_v32 = vpop.f32.mrf.mxu1 }
 0x36e   :  { %v1083_v18 = vadd.f32 %v1359_v32, %v966_v11  ;;  %v1088_v29 = vmax.f32 %v1072_v22, 0.0  ;;  %v1023_v37 = vadd.f32 %v1022_v16, %v956_v20  ;;  %v1087_v42 = vmax.f32 %v1021_v40, 0.0 }
 0x36f   :  { %v1024_v19 = vpop.f32.mrf.mxu0  ;;  %v1074_v21 = vpop.f32.mrf.mxu1 }
 0x370   :  { %v1097_v23 = vmax.f32 %v1083_v18, 0.0  ;;  %v1075_v24 = vadd.f32 %v1074_v21, %v956_v20  ;;  %v1025_v31 = vadd.f32 %v1024_v19, %v956_v20 }
 0x371   :  { %v1028_v25 = vpop.f32.mrf.mxu0 }
 0x372   :  { %v1104_v26 = vpack.c.bf16 %v1097_v23, %v1094_v6  ;;  %v1091_v27 = vmax.f32 %v1075_v24, 0.0  ;;  %v1029_v38 = vadd.f32 %v1028_v25, %v961_v9  ;;  %v1090_v41 = vmax.f32 %v1025_v31, 0.0 }
 0x373   :  { %v1030_v28 = vpop.f32.mrf.mxu0 }
 0x374   :  { %1361 = vmatpush3.bf16.msra.mxu0 %v1104_v26  ;;  %v1031_v36 = vadd.f32 %v1030_v28, %v961_v9  ;;  %v1101_v47 = vpack.c.bf16 %v1091_v27, %v1088_v29  ;;  %v1092_v52 = vmax.f32 %v1029_v38, 0.0  ;;  %v1100_v55 = vpack.c.bf16 %v1090_v41, %v1087_v42 }
 0x375   :  { %v1032_v30 = vpop.f32.mrf.mxu0  ;;  %1362 = vmatprep.subr.bf16.mxu0 %v1429_v3  ;;  %v1089_v3 = vmax.f32 %v1023_v37, 0.0 }
 0x376   :  { %v1033_v46 = vadd.f32 %v1032_v30, %v966_v11  ;;  %v1093_v50 = vmax.f32 %v1031_v36, 0.0 }
 0x377   :  { %v1034_v39 = vpop.f32.mrf.mxu0  ;;  %v1099_v43 = vpack.c.bf16 %v1089_v3, %v1086_v56 }
 0x378   :  { %v1035_v48 = vadd.f32 %v1034_v39, %v966_v11  ;;  %v1095_v49 = vmax.f32 %v1033_v46, 0.0  ;;  %1363 = vmatpush3.bf16.msra.mxu0 %v1101_v47 }
 0x37a   :  { %v1096_v51 = vmax.f32 %v1035_v48, 0.0  ;;  %v1102_v54 = vpack.c.bf16 %v1095_v49, %v1092_v52 }
 0x37b   :  { %1365 = vmatmul.mubr.msk.bf16.vlgmr.msra.gmra.mxu0 %vm348_vm3, %v1098_v34 }
 0x37c   :  { %v1103_v53 = vpack.c.bf16 %v1096_v51, %v1093_v50 }
 0x37e   :  { %1125 = vmatprep.subr.bf16.mxu1 %v1103_v53 }
 0x37f   :  { %1126 = vmatpush1.bf16.msra.mxu1 %v1102_v54 }
 0x380   :  { %1127 = vmatprep.subr.bf16.mxu1 %v1100_v55 }
 0x383   :  { %1128 = vmatpush1.bf16.msra.mxu1 %v1099_v43 }
 0x386   :  { %1266 = vmatmul.mubr.msk.bf16.vlgmr.msra.gmra.mxu1 %vm348_vm3, %v1098_v34 }
 0x43b   :  { %v1188_v58 = vpop.f32.mrf.mxu0 }
 0x43c   :  { %v1189_v59 = vadd.f32 %v1188_v58, %v1108_v57 }
 0x43d   :  { %v1366_v60 = vpop.f32.mrf.mxu0 }
 0x43e   :  { %1196 = vst [vmem:[#allocation2 + $0x10] sm:$0xff] %v1189_v59 }
 0x43f   :  { %v1191_v33 = vpop.f32.mrf.mxu0 }
 0x441   :  { %v1367_v61 = vpop.f32.mrf.mxu0 }
 0x446   :  { %v1147_v62 = vpop.f32.mrf.mxu1 }
 0x447   :  { %v1148_v0 = vadd.f32 %v1147_v62, %v1108_v57 }
 0x448   :  { %v1149_v44 = vpop.f32.mrf.mxu1 }
 0x449   :  { %1194 = vst [vmem:[#allocation2] sm:$0xff] %v1148_v0  ;;  %v1150_v1 = vadd.f32 %v1149_v44, %v1108_v57 }
 0x44a   :  { %v1151_v2 = vpop.f32.mrf.mxu1 }
 0x44b   :  { %1195 = vst [vmem:[#allocation2 + $0x8] sm:$0xff] %v1150_v1 }
 0x44c   :  { %v1152_v4 = vpop.f32.mrf.mxu1 }
 0x44d   :  { %1418 = shalt.err (!%p1415_p4)
}
 0x44e   :  { %1206 = dma.vmem_to_hbm [thread:$0]  %s1204_s1, 384, %s1765_s11, [#allocation3]  }
 0x44f   :  { %1427 = dma.done.wait [#allocation3], 384  }
 0x450   :  { %1428 = vsyncadd [#allocation3], 4294966912 }
 0x451   :  { %1210 = vsyncpa [#allocation3], 1 }

</bundles_post_ra>
